<compile_context>
chip_gen: v7x
topology: tpu7x:2x2x1
jax: 0.10.0
libtpu: 0.0.40
codegen_flags: <defaults>
</compile_context>

<pallas_src>
import functools
import math

import jax
import jax.numpy as jnp
from jax.experimental import pallas as pl
from jax.experimental.pallas import tpu as pltpu


# ----------------------------------------------------------------------------
# Helpers
# ----------------------------------------------------------------------------
def _layernorm_f32(x, g, b, eps):
    mean = jnp.mean(x, axis=-1, keepdims=True)
    var = jnp.mean((x - mean) ** 2, axis=-1, keepdims=True)
    return (x - mean) * jax.lax.rsqrt(var + eps) * g + b


def _pick_walk_tile(N, B, Lp, D, dff, target_bytes):
    """Walks per block: big enough to amortize grid-step overhead, small enough
    for VMEM, and (when possible) leaving >=2 grid blocks for v7x megacore."""
    per_seq = Lp * (16 * D + 2 * dff + 4 * Lp) * 4     # rough live f32 bytes / sequence
    cap = max(1, int(target_bytes // (per_seq * B)))
    if N >= 2:
        cap = min(cap, max(1, N // 2))                  # keep >=2 parallel blocks
    tn = 1
    for d in range(1, N + 1):
        if N % d == 0 and d <= cap:
            tn = d
    return tn


def _vmem_limit_bytes(TS, Lp, D, dff, n_layers, H):
    f32 = 4
    act = TS * Lp * D * f32
    scores = TS * Lp * Lp * f32
    inter = 16 * act + 2 * TS * Lp * dff * f32 + 4 * scores
    blocks = 2 * act + 2 * 8 * D * f32                  # double-buffered in/out blocks
    weights = (n_layers * (3 * D * D + D * D + 2 * D * dff + 12 * D + dff)
               + 2 * D * H + 6 * D + H) * f32
    est = int((blocks + inter + weights) * 1.25)        # ~20-25% headroom
    return int(min(48 << 20, max(32 << 20, est)))       # safe on v5e/v6e/v7x


def _stack_layer_params(layers):
    out = {}
    for k in layers[0]:
        stacked = jnp.stack([lp[k] for lp in layers], axis=0)
        if stacked.ndim == 2:                           # biases / LN params
            stacked = stacked[:, None, :]               # (n_layers, 1, dim)
        out[k] = stacked
    return out


# ----------------------------------------------------------------------------
# Linear (M-tiled, optional bias / relu, bf16 MXU operands) — spmm stand-in
# ----------------------------------------------------------------------------
def _linear_kernel(x_ref, w_ref, *rest, activation, has_bias):
    if has_bias:
        b_ref, o_ref = rest
    else:
        (o_ref,) = rest
    y = jnp.dot(x_ref[...].astype(jnp.bfloat16),
                w_ref[...].astype(jnp.bfloat16),
                preferred_element_type=jnp.float32)
    if has_bias:
        y = y + b_ref[...]
    if activation == "relu":
        y = jnp.maximum(y, 0.0)
    o_ref[...] = y.astype(o_ref.dtype)


def pallas_linear(x, w, b=None, activation=None, max_rows=512):
    """x: (M, K), w: (K, N), optional b: (N,) -> (M, N) float32."""
    M, K = x.shape
    _, N = w.shape
    TM = M if M <= max_rows else max_rows
    grid = (pl.cdiv(M, TM),)
    in_specs = [pl.BlockSpec((TM, K), lambda i: (i, 0)),
                pl.BlockSpec((K, N), lambda i: (0, 0))]
    args = [x, w]
    if b is not None:
        in_specs.append(pl.BlockSpec((1, N), lambda i: (0, 0)))
        args.append(b.reshape(1, N).astype(jnp.float32))
    return pl.pallas_call(
        functools.partial(_linear_kernel, activation=activation, has_bias=b is not None),
        out_shape=jax.ShapeDtypeStruct((M, N), jnp.float32),
        grid=grid,
        in_specs=in_specs,
        out_specs=pl.BlockSpec((TM, N), lambda i: (i, 0)),
        compiler_params=pltpu.CompilerParams(dimension_semantics=("parallel",)),
    )(*args)


# ----------------------------------------------------------------------------
# Fully fused walk encoder: all transformer layers + final LN + mean over L
# + deepset MLP + per-block max over walks, in ONE pallas_call.
# ----------------------------------------------------------------------------
def _walk_encoder_kernel(x_ref,
                         w_in_ref, b_in_ref, w_out_ref, b_out_ref,
                         ln1_g_ref, ln1_b_ref,
                         w_ff1_ref, b_ff1_ref, w_ff2_ref, b_ff2_ref,
                         ln2_g_ref, ln2_b_ref,
                         lnf_g_ref, lnf_b_ref,
                         ds_w1_ref, ds_b1_ref, ds_w2_ref, ds_b2_ref,
                         o_ref, *, nhead, B, L_true, eps):
    TS, Lp, D = x_ref.shape
    n_layers = w_in_ref.shape[0]
    dh = D // nhead
    scale = 1.0 / math.sqrt(dh)

    # ---- constants hoisted out of the layer / head loops ----
    lane = jax.lax.broadcasted_iota(jnp.int32, (1, 1, D), 2)
    head_masks = [((lane >= h * dh) & (lane < (h + 1) * dh)).astype(jnp.bfloat16)
                  for h in range(nhead)]
    key_pos = jax.lax.broadcasted_iota(jnp.int32, (1, 1, Lp), 2)
    key_bias = jnp.where(key_pos < L_true, 0.0, -1e30).astype(jnp.float32)
    tok_pos = jax.lax.broadcasted_iota(jnp.int32, (1, Lp, 1), 1)
    tok_valid = (tok_pos < L_true).astype(jnp.float32)

    # residual stream, kept in VMEM/registers across ALL layers (no HBM trips)
    x = x_ref[...].astype(jnp.float32).reshape(TS * Lp, D)

    for li in range(n_layers):                               # static unroll over layers
        # ---- fused QKV projection (bf16 MXU operands, f32 accumulation) ----
        qkv = jnp.dot(x.astype(jnp.bfloat16), w_in_ref[li].astype(jnp.bfloat16),
                      preferred_element_type=jnp.float32) + b_in_ref[li]
        q = (qkv[:, :D] * scale).reshape(TS, Lp, D).astype(jnp.bfloat16)   # pre-scaled
        k = qkv[:, D:2 * D].reshape(TS, Lp, D).astype(jnp.bfloat16)
        v = qkv[:, 2 * D:].reshape(TS, Lp, D).astype(jnp.bfloat16)

        # ---- multi-head attention; heads stay packed in the lane dimension ----
        attn = None
        for h in range(nhead):                               # static unroll over heads
            qh = q * head_masks[h]         # mask folded into q; k stays unmasked
            s = jnp.einsum("sid,sjd->sij", qh, k,
                           preferred_element_type=jnp.float32) + key_bias
            m = jnp.max(s, axis=-1, keepdims=True)
            p = jnp.exp(s - m)
            p = p * pl.reciprocal(jnp.sum(p, axis=-1, keepdims=True), approx=True)
            oh = jnp.einsum("sij,sjd->sid", p.astype(jnp.bfloat16),
                            v * head_masks[h],               # mask only v (placement)
                            preferred_element_type=jnp.float32)
            attn = oh if attn is None else attn + oh

        attn = jnp.dot(attn.reshape(TS * Lp, D).astype(jnp.bfloat16),
                       w_out_ref[li].astype(jnp.bfloat16),
                       preferred_element_type=jnp.float32) + b_out_ref[li]

        # ---- residual + post-LN 1 ----
        y = _layernorm_f32(x + attn, ln1_g_ref[li], ln1_b_ref[li], eps)

        # ---- feed-forward (FF1 relu + FF2) ----
        hdn = jnp.dot(y.astype(jnp.bfloat16), w_ff1_ref[li].astype(jnp.bfloat16),
                      preferred_element_type=jnp.float32) + b_ff1_ref[li]
        hdn = jnp.maximum(hdn, 0.0)
        ff = jnp.dot(hdn.astype(jnp.bfloat16), w_ff2_ref[li].astype(jnp.bfloat16),
                     preferred_element_type=jnp.float32) + b_ff2_ref[li]

        # ---- residual + post-LN 2 ----
        x = _layernorm_f32(y + ff, ln2_g_ref[li], ln2_b_ref[li], eps)

    # ---- fused epilogue: final LN -> mean over true L -> deepset MLP -> max ----
    xn = _layernorm_f32(x, lnf_g_ref[...], lnf_b_ref[...], eps)
    xn = xn.reshape(TS, Lp, D) * tok_valid                   # drop padded tokens
    walk_repr = jnp.sum(xn, axis=1) * (1.0 / L_true)         # (TS, D) mean over true L

    h1 = jnp.dot(walk_repr.astype(jnp.bfloat16), ds_w1_ref[...].astype(jnp.bfloat16),
                 preferred_element_type=jnp.float32) + ds_b1_ref[...]
    h1 = jnp.maximum(h1, 0.0)
    wh = jnp.dot(h1.astype(jnp.bfloat16), ds_w2_ref[...].astype(jnp.bfloat16),
                 preferred_element_type=jnp.float32) + ds_b2_ref[...]

    # partial max over the walks held in this block (block rows are n-major)
    o_ref[...] = jnp.max(wh.reshape(TS // B, B, D), axis=0,
                         keepdims=True).astype(o_ref.dtype)


def pallas_walk_encoder(x, layer_params, final_ln, deepset, *, nhead, B, L_true,
                        eps=1e-5, target_block_bytes=12 << 20):
    """x: (S, Lp, D) n-major (s = walk*B + batch) -> (B, D) program repr."""
    S, Lp, D = x.shape
    assert S % B == 0
    N = S // B
    n_layers = layer_params["w_in"].shape[0]
    dff = layer_params["w_ff1"].shape[-1]
    H = deepset["w1"].shape[-1]

    TN = _pick_walk_tile(N, B, Lp, D, dff, target_block_bytes)
    TS = TN * B
    num_blocks = N // TN

    def rep(shape):
        return pl.BlockSpec(shape, lambda i, n=len(shape): (0,) * n)

    partial = pl.pallas_call(
        functools.partial(_walk_encoder_kernel, nhead=nhead, B=B,
                          L_true=L_true, eps=eps),
        out_shape=jax.ShapeDtypeStruct((num_blocks, B, D), jnp.float32),
        grid=(num_blocks,),
        in_specs=[
            pl.BlockSpec((TS, Lp, D), lambda i: (i, 0, 0)),
            rep((n_layers, D, 3 * D)), rep((n_layers, 1, 3 * D)),   # qkv in-proj
            rep((n_layers, D, D)), rep((n_layers, 1, D)),           # out-proj
            rep((n_layers, 1, D)), rep((n_layers, 1, D)),           # LN1
            rep((n_layers, D, dff)), rep((n_layers, 1, dff)),       # FF1
            rep((n_layers, dff, D)), rep((n_layers, 1, D)),         # FF2
            rep((n_layers, 1, D)), rep((n_layers, 1, D)),           # LN2
            rep((1, D)), rep((1, D)),                               # final LN
            rep((D, H)), rep((1, H)),                               # deepset FC1
            rep((H, D)), rep((1, D)),                               # deepset FC2
        ],
        out_specs=pl.BlockSpec((1, B, D), lambda i: (i, 0, 0)),
        compiler_params=pltpu.CompilerParams(
            dimension_semantics=("parallel",),
            vmem_limit_bytes=_vmem_limit_bytes(TS, Lp, D, dff, n_layers, H)),
    )(x,
      layer_params["w_in"], layer_params["b_in"],
      layer_params["w_out"], layer_params["b_out"],
      layer_params["ln1_g"], layer_params["ln1_b"],
      layer_params["w_ff1"], layer_params["b_ff1"],
      layer_params["w_ff2"], layer_params["b_ff2"],
      layer_params["ln2_g"], layer_params["ln2_b"],
      final_ln["g"], final_ln["b"],
      deepset["w1"], deepset["b1"], deepset["w2"], deepset["b2"])

    return jnp.max(partial, axis=0)      # tiny cross-block reduce (keeps grid parallel)


# ----------------------------------------------------------------------------
# Model glue: embedding gathers + positional adds, built n-major directly
# ----------------------------------------------------------------------------
def token_encoder(params, node_idx, edge_idx, node_val_mat):
    """Returns the token sequence n-major: (S = N*B, L, D)."""
    Ln, N, B = node_idx.shape
    Le = edge_idx.shape[0]
    D = params["node_embed"].shape[1]
    V = node_val_mat.shape[1]

    ni = jnp.transpose(node_idx, (1, 2, 0))                   # tiny int transpose
    ne = jnp.take(params["node_embed"], ni, axis=0)           # (N, B, Ln, D)
    ne = ne + params["node_pos"][:Ln][None, None, :, :]

    ei = jnp.transpose(edge_idx, (1, 2, 0))
    ee = jnp.take(params["edge_embed"], ei, axis=0)           # (N, B, Le, D)
    ee = ee + params["edge_pos"][:Le][None, None, :, :]

    # node_val_mat rows are (Ln, N, B)-ordered; permute the narrow (V-wide)
    # matrix so the spmm output is already n-major (no (L,S,D) transpose later).
    nv_mat = node_val_mat.reshape(Ln, N, B, V).transpose(1, 2, 0, 3).reshape(N * B * Ln, V)
    nv = pallas_linear(nv_mat, params["val_embed"])           # spmm stand-in (no bias)
    nv = nv.reshape(N, B, Ln, D) + params["val_pos"][:Ln][None, None, :, :]

    seq = jnp.concatenate([ne, ee, nv], axis=2)               # (N, B, L, D)
    return seq.reshape(N * B, seq.shape[2], D)                # (S, L, D)


def walk_set_embed(params, node_idx, edge_idx, node_val_mat, nhead):
    x = token_encoder(params, node_idx, edge_idx, node_val_mat)   # (S, L, D) n-major
    S, L, D = x.shape
    B = node_idx.shape[2]
    Lp = max(8, ((L + 7) // 8) * 8)            # sublane-aligned padded walk length
    if Lp != L:
        x = jnp.pad(x, ((0, 0), (0, Lp - L), (0, 0)))          # padded keys masked in-kernel

    layer_params = _stack_layer_params(params["layers"])
    final_ln = {"g": params["ln_f_g"].reshape(1, D), "b": params["ln_f_b"].reshape(1, D)}
    deepset = {"w1": params["ds_w1"], "b1": params["ds_b1"].reshape(1, -1),
               "w2": params["ds_w2"], "b2": params["ds_b2"].reshape(1, -1)}
    return pallas_walk_encoder(x, layer_params, final_ln, deepset,
                               nhead=nhead, B=B, L_true=L)     # (B, D)
    # TODO(synk): predict-phase branch (torch.topk over per-walk argmax counts +
    # attention-weight walk selection) depends on cmd_args / returned attn
    # weights; not implemented.


# ----------------------------------------------------------------------------
# Deterministic parameter init (matmul weights in bf16, LN/bias in f32)
# ----------------------------------------------------------------------------
def init_params(key, *, num_node_types, num_edge_types, vocab, D, dff, n_layers,
                max_len=50):
    keys = iter(jax.random.split(key, 8 + 4 * n_layers))

    def w(shape, dtype=jnp.bfloat16):
        return (0.02 * jax.random.normal(next(keys), shape)).astype(dtype)

    params = {
        "node_embed": w((num_node_types, D), jnp.float32),
        "edge_embed": w((num_edge_types, D), jnp.float32),
        "val_embed": w((vocab, D)),                    # bf16 matmul weight
        "node_pos": w((max_len, D), jnp.float32),
        "edge_pos": w((max_len, D), jnp.float32),
        "val_pos": w((max_len, D), jnp.float32),
        "ln_f_g": jnp.ones((D,), jnp.float32),
        "ln_f_b": jnp.zeros((D,), jnp.float32),
        "ds_w1": w((D, 2 * D)),
        "ds_b1": jnp.zeros((2 * D,), jnp.float32),
        "ds_w2": w((2 * D, D)),
        "ds_b2": jnp.zeros((D,), jnp.float32),
        "layers": [],
    }
    for _ in range(n_layers):
        params["layers"].append({
            "w_in": w((D, 3 * D)), "b_in": jnp.zeros((3 * D,), jnp.float32),
            "w_out": w((D, D)), "b_out": jnp.zeros((D,), jnp.float32),
            "ln1_g": jnp.ones((D,), jnp.float32), "ln1_b": jnp.zeros((D,), jnp.float32),
            "w_ff1": w((D, dff)), "b_ff1": jnp.zeros((dff,), jnp.float32),
            "w_ff2": w((dff, D)), "b_ff2": jnp.zeros((D,), jnp.float32),
            "ln2_g": jnp.ones((D,), jnp.float32), "ln2_b": jnp.zeros((D,), jnp.float32),
        })
    return params


# ----------------------------------------------------------------------------
# Main
# ----------------------------------------------------------------------------
if __name__ == "__main__":
    # small config: embed_dim=32, nhead=4, 2 transformer layers, dff=64
    D, nhead, n_layers, dff = 32, 4, 2, 64
    num_node_types, num_edge_types, vocab = 7, 5, 11
    Ln, N, B = 4, 3, 2          # nodes-per-walk, num walks, batch
    Le = Ln - 1                 # edges-per-walk -> total L = 3*Ln - 1 = 11

    key = jax.random.PRNGKey(0)
    kp, k1, k2, k3 = jax.random.split(key, 4)
    params = init_params(kp, num_node_types=num_node_types,
                         num_edge_types=num_edge_types, vocab=vocab,
                         D=D, dff=dff, n_layers=n_layers)

    node_idx = jax.random.randint(k1, (Ln, N, B), 0, num_node_types, dtype=jnp.int32)
    edge_idx = jax.random.randint(k2, (Le, N, B), 0, num_edge_types, dtype=jnp.int32)
    # dense stand-in for the sparse node-value matrix (rows sum to 1)
    node_val_mat = jax.random.uniform(k3, (Ln * N * B, vocab), dtype=jnp.float32)
    node_val_mat = node_val_mat / jnp.sum(node_val_mat, axis=-1, keepdims=True)

    prog_repr = walk_set_embed(params, node_idx, edge_idx, node_val_mat, nhead)
    prog_repr = jax.block_until_ready(prog_repr)
    assert prog_repr.shape == (B, D) and prog_repr.dtype == jnp.float32
    assert bool(jnp.all(jnp.isfinite(prog_repr)))
    print("KERNEL_OK")
</pallas_src>

<mosaic_0001>
module attributes {stable_mosaic.version = 11 : i64} {
  func.func @_linear_kernel(%arg0: i32, %arg1: memref<24x11xf32, #tpu.memory_space<vmem>>, %arg2: memref<11x32xbf16, #tpu.memory_space<vmem>>, %arg3: memref<24x32xf32, #tpu.memory_space<vmem>>) attributes {dimension_semantics = [#tpu.dimension_semantics<parallel>], iteration_bounds = array<i64: 1>, scalar_prefetch = 0 : i64, scratch_operands = 0 : i64, tpu.core_type = #tpu.core_type<tc>, window_params = [{transform_indices = @transform_0, window_bounds = array<i64: 24, 11>}, {pipeline_mode = #tpu.pipeline_mode<synchronous>, transform_indices = @transform_1, window_bounds = array<i64: 11, 32>}, {transform_indices = @transform_2, window_bounds = array<i64: 24, 32>}]} {
    %c0 = arith.constant 0 : index
    %c0_0 = arith.constant 0 : index
    %0 = vector.load %arg1[%c0, %c0_0] : memref<24x11xf32, #tpu.memory_space<vmem>>, vector<24x11xf32>
    %1 = arith.truncf %0 : vector<24x11xf32> to vector<24x11xbf16>
    %c0_1 = arith.constant 0 : index
    %c0_2 = arith.constant 0 : index
    %2 = vector.load %arg2[%c0_1, %c0_2] : memref<11x32xbf16, #tpu.memory_space<vmem>>, vector<11x32xbf16>
    %cst = arith.constant dense<0.000000e+00> : vector<24x32xf32>
    %3 = tpu.matmul %1, %2, %cst {dimension_numbers = #tpu.dot_dimension_numbers<[1], [0], [0], [1], [0, 0, 1, 1], [], []>} : vector<24x11xbf16>, vector<11x32xbf16>, vector<24x32xf32> -> vector<24x32xf32>
    %c0_3 = arith.constant 0 : index
    %c0_4 = arith.constant 0 : index
    %4 = vector.load %arg3[%c0_3, %c0_4] : memref<24x32xf32, #tpu.memory_space<vmem>>, vector<24x32xf32>
    tpu.vector_store %arg3[%c0_3, %c0_4], %3 {strides = array<i32>} : memref<24x32xf32, #tpu.memory_space<vmem>>, vector<24x32xf32>,
    return
  }
  func.func @transform_0(%arg0: i32) -> (i32, i32) {
    %c0_i32 = arith.constant 0 : i32
    %c0_i32_0 = arith.constant 0 : i32
    return %arg0, %c0_i32 : i32, i32
  }
  func.func @transform_1(%arg0: i32) -> (i32, i32) {
    %c0_i32 = arith.constant 0 : i32
    %c0_i32_0 = arith.constant 0 : i32
    %c0_i32_1 = arith.constant 0 : i32
    return %c0_i32, %c0_i32_0 : i32, i32
  }
  func.func @transform_2(%arg0: i32) -> (i32, i32) {
    %c0_i32 = arith.constant 0 : i32
    %c0_i32_0 = arith.constant 0 : i32
    return %arg0, %c0_i32 : i32, i32
  }
}

</mosaic_0001>

<bundles_post_ra>
// kernel: tpu_custom_call.1
= control target key start
LH: loop header
LB: loop body
LE: loop exit
PB: predicated region body
PF: predicated region fallthrough
CT: control target
= control target key end

     0   :  { %vm32_vm0 = vcmask 1044480   ;;  %vm33_vm1 = vcmask 1045504   ;;  %vm25_vm2 = vcmask 89088   ;;  %v148_v3 = vmov 65535   ;;  %s191_s0 = inlined_call_operand.vmem [shape: f32[24,11], index: 0, kind: input, shape index: {}]   ;;  %s192_s1 = inlined_call_operand.vmem [shape: bf16[11,32], index: 1, kind: input, shape index: {}]   ;;  %s193_s2 = inlined_call_operand.hbm [shape: f32[24,32], index: 2, kind: output, shape index: {}]  }
   0x1   :  { %v123_v0 = vld [vmem:[%s192_s1] sm:$0x3f]   ;;  %v14_v2 = vld [vmem:[%s191_s0 + $0x8] sm:$0xff]  ;;  %v34_v4 = vsel %vm32_vm0, 4294967295, %v148_v3 }
   0x2   :  { %v13_v1 = vld [vmem:[%s191_s0] sm:$0xff] }
   0x3   :  { %v16_v5 = vpack.c.bf16 %v14_v2, %v13_v1 }
   0x4   :  { %7 = vsyncpa [#allocation3], 0  ;;  %v35_v6 = vsel %vm33_vm1, %v34_v4, 0  ;;  %v15_v7 = vld [vmem:[%s191_s0 + $0x10] sm:$0xff]  ;;  %vm87_vm3 = vcmask 261120   ;;  %s149_s1 = smov [#allocation2]  }
   0x5   :  { %v37_v8 = vand.u32 %v123_v0, %v35_v6  ;;  %115 = vmatprep.mubr.msk.bf16.mxu0 %vm25_vm2, %v16_v5  ;;  %v17_v9 = vpack.c.bf16 %v15_v7, %v15_v7  ;;  %s96_s17 = sshll.u32 %s149_s1, 4  ;;  %s97_s17 = int_to_ptr.vmem [resolvable:$true] %s96_s17 }
   0x6   :  { %s124_s18 = scalar_lea.vmem %s97_s17, 384  ;;  %p129_p1 = scmp.lt.s32.totalorder %s97_s17, %s97_s17 }
   0x7   :  { %113 = vmatprep.subr.bf16.mxu0 %v37_v8  ;;  %p125_p0 = scmp.ne.s32.totalorder %s97_s17, %s124_s18  ;;  %p130_p2 = scmp.lt.s32.totalorder %s124_s18, %s124_s18 }
   0x8   :  { %114 = vmatpush3.bf16.msra.mxu0 %v37_v8 }
   0x9   :  { %p131_p3 = por %p130_p2, %p129_p1 }
   0xb   :  { %116 = vmatmul.mubr.msk.bf16.vlgmr.msra.gmra.mrb[0].mxu0 %vm25_vm2, %v17_v9  ;;  %p132_p4 = pnand %p131_p3, %p125_p0 }
  0xde   :  { %v117_v10 = vpop.f32.mrb[0].mxu0 }
  0xdf   :  { %90 = vst.msk [vmem:[#allocation2 + $0x10] sm:$0xff] %vm87_vm3, %v117_v10  ;;  %v73_v11 = vpop.f32.mrb[1].mxu0 }
  0xe0   :  { %88 = vst.msk [vmem:[#allocation2] sm:$0xff] %vm87_vm3, %v73_v11  ;;  %v118_v12 = vpop.f32.mrb[2].mxu0 }
  0xe1   :  { %v76_v13 = vpop.f32.mrb[3].mxu0 }
  0xe2   :  { %89 = vst.msk [vmem:[#allocation2 + $0x8] sm:$0xff] %vm87_vm3, %v76_v13 }
  0xe3   :  { %135 = shalt.err (!%p132_p4)
}
  0xe4   :  { %s136_s20 = scalar_lea.hbm %s193_s2, 384 }
  0xe5   :  { %p137_p5 = scmp.ne.s32.totalorder %s193_s2, %s136_s20  ;;  %p140_p6 = scmp.lt.u32.totalorder %s136_s20, %s193_s2 }
  0xe7   :  { %p142_p7 = pnand %p140_p6, %p137_p5 }
  0xe9   :  { %145 = shalt.err (!%p142_p7)
}
  0xea   :  { %s150_s25 = smov 128   ;;  %s151_s26 = smov 8  }
  0xeb   :  { %102 = dma.vmem_to_hbm [thread:$0]  %s97_s17, 384, %s193_s2, [#allocation3], %s150_s25, %s150_s25, %s151_s26  }
  0xec   :  { %146 = dma.done.wait [#allocation3], 384  }
  0xed   :  { %147 = vsyncadd [#allocation3], 4294966912 }
  0xee   :  { %106 = vsyncpa [#allocation3], 1 }

</bundles_post_ra>
